<compile_context>
chip_gen: v6e
topology: v6e:2x2x1
jax: 0.10.0
libtpu: 0.0.40
codegen_flags: <defaults>
</compile_context>

<pallas_src>
import functools

import jax
import jax.numpy as jnp
from jax.experimental import pallas as pl
from jax.experimental.pallas import tpu as pltpu

EPS = 1e-5
LANE = 128  # TPU lane width; every feature dim is zero-padded to this.

# Packed-slab layout (module topology is static):
#   weight slab rows : 0=w0 1=wr0 2=w1 3=wr1 4=w2 5=wr2 6=w3 7=wfc
#   vector slab rows : 0=b0 1=g0 2=be0 3=br0 4=b1 5=g1 6=be1 7=br1
#                      8=b2 9=g2 10=be2 11=br2 12=b3 13=bfc  (14..15 = pad)


def tbresnet_kernel(x_ref, w_ref, v_ref, o_ref, xpad_ref):
    B, F = x_ref.shape
    cdt = w_ref.dtype  # MXU operand dtype (bf16 by default -> 1-pass matmuls)

    def vec(i):
        # Ref-side static slice: no 16-sublane materialize + re-slice per use.
        return v_ref[i:i + 1, :]                          # (1, 128) f32

    def linear(h, wi, bi):
        # Matmul operands in `cdt` (bf16 -> single MXU pass); accumulation and
        # everything downstream stays f32.
        return jnp.dot(h.astype(cdt), w_ref[wi],
                       preferred_element_type=jnp.float32) + vec(bi)

    def batchnorm(h, gi, bi):
        # Training-mode BatchNorm1d (batch stats, biased variance, eps=1e-5)
        # folded into a per-feature scale/shift.  Statistics stay in f32.
        mean = jnp.mean(h, axis=0, keepdims=True)
        msq = jnp.mean(h * h, axis=0, keepdims=True)
        var = msq - mean * mean
        scale = vec(gi) * jax.lax.rsqrt(var + EPS)
        shift = vec(bi) - mean * scale
        return h * scale + shift                          # 2 VALU ops / elem

    def resblock(h, wi, bi):
        # Same Linear applied twice (shared weights), as in ResidualBlock.
        # TODO(synk): at tiny B the shared RHS could be held in MXU staging
        # registers (pltpu.matmul_push_rhs/acc_lhs/pop) to skip one of the
        # three identical weight pushes; kept as plain dots for portability.
        y = jnp.maximum(linear(h, wi, bi), 0.0)
        y = linear(y, wi, bi)
        return jnp.maximum(h + y, 0.0)

    # Zero-pad the (B, F) input to (B, 128) inside the kernel (no wrapper pad,
    # no padded HBM read).  Padded lanes are exactly 0 and stay 0 throughout.
    xpad_ref[...] = jnp.zeros(xpad_ref.shape, xpad_ref.dtype)
    xpad_ref[:, 0:F] = x_ref[...]
    x = xpad_ref[...]

    # Stage 0: Linear -> ReLU -> BatchNorm -> ResidualBlock
    h = jnp.maximum(linear(x, 0, 0), 0.0)
    h = batchnorm(h, 1, 2)
    h = resblock(h, 1, 3)
    # Stage 1
    h = jnp.maximum(linear(h, 2, 4), 0.0)
    h = batchnorm(h, 5, 6)
    h = resblock(h, 3, 7)
    # Stage 2
    h = jnp.maximum(linear(h, 4, 8), 0.0)
    h = batchnorm(h, 9, 10)
    h = resblock(h, 5, 11)
    # Stage 3: Linear -> ReLU
    h = jnp.maximum(linear(h, 6, 12), 0.0)
    # Final fc (output kept lane-padded to 128; sliced wrapper-side)
    o_ref[...] = linear(h, 7, 13)


def pack_params(params, matmul_dtype=jnp.bfloat16):
    """Pack the 22 per-layer arrays into one weight slab + one vector slab.

    Weights go into `matmul_dtype` (bf16 default -> single-pass MXU, half the
    DMA bytes).  Biases/gammas/betas stay f32 (used in f32 elementwise math).
    Padded entries are exactly zero (required for padded-lane correctness).
    """
    (w0, b0, g0, be0, wr0, br0,
     w1, b1, g1, be1, wr1, br1,
     w2, b2, g2, be2, wr2, br2,
     w3, b3, wfc, bfc) = params

    def pad_mat(w):
        # TODO(synk): feature dims > 128 would need a multi-tile K loop.
        assert w.shape[0] <= LANE and w.shape[1] <= LANE
        out = jnp.zeros((LANE, LANE), matmul_dtype)
        return out.at[:w.shape[0], :w.shape[1]].set(w.astype(matmul_dtype))

    def pad_vec(v):
        v = v.reshape(1, -1)
        out = jnp.zeros((1, LANE), jnp.float32)
        return out.at[:, :v.shape[1]].set(v.astype(jnp.float32))

    mats = [w0, wr0, w1, wr1, w2, wr2, w3, wfc]
    vecs = [b0, g0, be0, br0, b1, g1, be1, br1,
            b2, g2, be2, br2, b3, bfc]
    w_slab = jnp.stack([pad_mat(m) for m in mats])                    # (8,128,128)
    v_slab = jnp.concatenate([pad_vec(v) for v in vecs]
                             + [jnp.zeros((2, LANE), jnp.float32)])   # (16,128)
    return w_slab, v_slab


def _vmem_limit_bytes(batch, slab_bytes):
    """Derive a B-dependent VMEM limit, capped to the chip's capacity."""
    # Working set: padded-x scratch + a handful of live (B,128) f32 activation
    # slabs + bf16 dot temporaries + output (~16 f32 row-slabs of headroom),
    # plus the parameter slabs and misc compiler scratch.
    need = batch * LANE * 4 * 16 + slab_bytes + (2 << 20)
    try:
        cap = int(pltpu.get_tpu_info().vmem_capacity_bytes)   # 128 MiB v5e/v6e, 64 MiB v7x
    except Exception:
        cap = 64 << 20  # conservative fallback: v7x per-TensorCore VMEM
    limit = min(max(need, 32 << 20), cap - (16 << 20))        # ~112 MiB v6e / ~48 MiB v7x
    if need > limit:
        raise ValueError(
            f"batch={batch} needs ~{need >> 20} MiB VMEM which exceeds the "
            f"~{limit >> 20} MiB single-block budget on this chip; split the "
            "batch wrapper-side (BatchNorm batch-stats make in-kernel B tiling "
            "non-trivial)."
            # TODO(synk): tiled two-pass (stats accumulate, then apply) path.
        )
    return limit


@functools.partial(jax.jit, static_argnames=("num_outputs",))
def tbresnet_forward(x, w_slab, v_slab, num_outputs):
    B, F = x.shape
    slab_bytes = (w_slab.size * jnp.dtype(w_slab.dtype).itemsize
                  + v_slab.size * jnp.dtype(v_slab.dtype).itemsize)
    vmem_limit = _vmem_limit_bytes(B, slab_bytes)

    n_matmuls = 11  # 3 per BN-stage * 3 stages + stage-3 linear + final fc
    cost = pl.CostEstimate(
        flops=2 * B * LANE * LANE * n_matmuls,
        transcendentals=3 * LANE,  # rsqrt per BN feature lane
        bytes_accessed=B * F * 4 + slab_bytes + B * LANE * 4,
    )

    out = pl.pallas_call(
        tbresnet_kernel,
        out_shape=jax.ShapeDtypeStruct((B, LANE), jnp.float32),
        in_specs=[pl.BlockSpec(memory_space=pltpu.MemorySpace.VMEM)] * 3,
        out_specs=pl.BlockSpec(memory_space=pltpu.MemorySpace.VMEM),
        scratch_shapes=[pltpu.VMEM((B, LANE), jnp.float32)],  # in-kernel padded x
        compiler_params=pltpu.CompilerParams(vmem_limit_bytes=vmem_limit),
        cost_estimate=cost,
    )(x, w_slab, v_slab)
    return out[:, :num_outputs]


def make_params(key, num_inputs, num_outputs, num_hiddens):
    """Deterministic synthetic parameters matching TBResNet.__init__ shapes."""
    hs = [round(num_hiddens / 2 ** i) for i in range(4)]
    keys = jax.random.split(key, 16)
    ki = iter(range(16))

    def lin(k_w, k_b, fan_in, fan_out):
        # small random init; weights stored as (in, out)
        w = 0.1 * jax.random.normal(k_w, (fan_in, fan_out), jnp.float32)
        b = 0.1 * jax.random.normal(k_b, (1, fan_out), jnp.float32)
        return w, b

    params = []
    in_dim = num_inputs
    for h in hs[:3]:
        w, b = lin(keys[next(ki)], keys[next(ki)], in_dim, h)      # Linear
        gamma = jnp.ones((1, h), jnp.float32)                       # BatchNorm1d weight
        beta = jnp.zeros((1, h), jnp.float32)                       # BatchNorm1d bias
        wr, br = lin(keys[next(ki)], keys[next(ki)], h, h)          # ResidualBlock.fc (shared)
        params += [w, b, gamma, beta, wr, br]
        in_dim = h
    w3, b3 = lin(keys[next(ki)], keys[next(ki)], in_dim, hs[3])     # last Linear in block
    wfc, bfc = lin(keys[next(ki)], keys[next(ki)], hs[3], num_outputs)
    params += [w3, b3, wfc, bfc]
    return params


def tbresnet_ref(x, params, matmul_dtype=jnp.float32):
    """Pure-JAX reference (module semantics).

    With matmul_dtype=bf16 it mirrors the kernel's precision model exactly
    (bf16 dot operands, f32 accumulation, f32 BN/ReLU) for a tight check.
    """
    (w0, b0, g0, be0, wr0, br0,
     w1, b1, g1, be1, wr1, br1,
     w2, b2, g2, be2, wr2, br2,
     w3, b3, wfc, bfc) = params

    def dot(a, w):
        return jnp.dot(a.astype(matmul_dtype), w.astype(matmul_dtype),
                       preferred_element_type=jnp.float32)

    def bn(h, g, be):
        m = jnp.mean(h, axis=0, keepdims=True)
        v = jnp.mean((h - m) ** 2, axis=0, keepdims=True)
        return (h - m) / jnp.sqrt(v + EPS) * g + be

    def res(h, w, b):
        y = jnp.maximum(dot(h, w) + b, 0.0)
        y = dot(y, w) + b
        return jnp.maximum(h + y, 0.0)

    h = jnp.maximum(dot(x, w0) + b0, 0.0)
    h = res(bn(h, g0, be0), wr0, br0)
    h = jnp.maximum(dot(h, w1) + b1, 0.0)
    h = res(bn(h, g1, be1), wr1, br1)
    h = jnp.maximum(dot(h, w2) + b2, 0.0)
    h = res(bn(h, g2, be2), wr2, br2)
    h = jnp.maximum(dot(h, w3) + b3, 0.0)
    return dot(h, wfc) + bfc


if __name__ == "__main__":
    # Small shapes consistent with the module's tabular [B, F] forward.
    B, NUM_INPUTS, NUM_OUTPUTS, NUM_HIDDENS = 8, 32, 1, 32

    key = jax.random.PRNGKey(0)
    kx, kp = jax.random.split(key)
    x = jax.random.normal(kx, (B, NUM_INPUTS), jnp.float32)
    params = make_params(kp, NUM_INPUTS, NUM_OUTPUTS, NUM_HIDDENS)
    w_slab, v_slab = pack_params(params)  # bf16 weight slab, f32 vector slab

    out = tbresnet_forward(x, w_slab, v_slab, NUM_OUTPUTS)
    out = jax.block_until_ready(out)
    assert out.shape == (B, NUM_OUTPUTS)

    # Structural/plumbing check at the kernel's exact precision model
    # (bf16 MXU operands, f32 accumulation, f32 BN).
    ref_bf16 = tbresnet_ref(x, params, matmul_dtype=jnp.bfloat16)
    assert jnp.allclose(out, ref_bf16, atol=1e-4, rtol=1e-4), (out, ref_bf16)

    # Sanity check against pure-f32 module numerics; the bf16 MXU inputs cost
    # roughly 1e-3 relative error end-to-end (the intended perf/precision trade).
    ref_f32 = tbresnet_ref(x, params)
    assert jnp.allclose(out, ref_f32, atol=3e-2, rtol=3e-2), (out, ref_f32)

    print("KERNEL_OK")
</pallas_src>

<mosaic_0001>
module attributes {stable_mosaic.version = 11 : i64} {
  func.func @tbresnet_kernel(%arg0: memref<8x32xf32, #tpu.memory_space<vmem>>, %arg1: memref<8x128x128xbf16, #tpu.memory_space<vmem>>, %arg2: memref<16x128xf32, #tpu.memory_space<vmem>>, %arg3: memref<8x128xf32, #tpu.memory_space<vmem>>, %arg4: memref<8x128xf32, #tpu.memory_space<vmem>>) attributes {dimension_semantics = [], scalar_prefetch = 0 : i64, scratch_operands = 1 : i64, tpu.core_type = #tpu.core_type<tc>} {
    %cst = arith.constant 0.000000e+00 : f32
    %0 = vector.broadcast %cst : f32 to vector<8x128xf32>
    %c0 = arith.constant 0 : index
    %c0_0 = arith.constant 0 : index
    %1 = vector.load %arg4[%c0, %c0_0] : memref<8x128xf32, #tpu.memory_space<vmem>>, vector<8x128xf32>
    tpu.vector_store %arg4[%c0, %c0_0], %0 {strides = array<i32>} : memref<8x128xf32, #tpu.memory_space<vmem>>, vector<8x128xf32>,
    %c0_1 = arith.constant 0 : index
    %c0_2 = arith.constant 0 : index
    %2 = vector.load %arg0[%c0_1, %c0_2] : memref<8x32xf32, #tpu.memory_space<vmem>>, vector<8x32xf32>
    %c0_3 = arith.constant 0 : index
    %c0_4 = arith.constant 0 : index
    %3 = vector.load %arg4[%c0_3, %c0_4] : memref<8x128xf32, #tpu.memory_space<vmem>>, vector<8x32xf32>
    tpu.vector_store %arg4[%c0_3, %c0_4], %2 {strides = array<i32>} : memref<8x128xf32, #tpu.memory_space<vmem>>, vector<8x32xf32>,
    %c0_5 = arith.constant 0 : index
    %c0_6 = arith.constant 0 : index
    %4 = vector.load %arg4[%c0_5, %c0_6] : memref<8x128xf32, #tpu.memory_space<vmem>>, vector<8x128xf32>
    %5 = arith.truncf %4 : vector<8x128xf32> to vector<8x128xbf16>
    %c0_7 = arith.constant 0 : index
    %c0_8 = arith.constant 0 : index
    %c0_9 = arith.constant 0 : index
    %6 = vector.load %arg1[%c0_7, %c0_8, %c0_9] : memref<8x128x128xbf16, #tpu.memory_space<vmem>>, vector<1x128x128xbf16>
    %7 = vector.shape_cast %6 : vector<1x128x128xbf16> to vector<128x128xbf16>
    %cst_10 = arith.constant dense<0.000000e+00> : vector<8x128xf32>
    %8 = tpu.matmul %5, %7, %cst_10 {dimension_numbers = #tpu.dot_dimension_numbers<[1], [0], [0], [1], [0, 0, 1, 1], [], []>} : vector<8x128xbf16>, vector<128x128xbf16>, vector<8x128xf32> -> vector<8x128xf32>
    %c0_11 = arith.constant 0 : index
    %c0_12 = arith.constant 0 : index
    %9 = vector.load %arg2[%c0_11, %c0_12] : memref<16x128xf32, #tpu.memory_space<vmem>>, vector<1x128xf32>
    %10 = vector.broadcast %9 : vector<1x128xf32> to vector<8x128xf32>
    %11 = arith.addf %8, %10 : vector<8x128xf32>
    %cst_13 = arith.constant 0.000000e+00 : f32
    %12 = vector.broadcast %cst_13 : f32 to vector<8x128xf32>
    %13 = arith.maximumf %11, %12 : vector<8x128xf32>
    %cst_14 = arith.constant dense<0.000000e+00> : vector<128xf32>
    %14 = vector.multi_reduction <add>, %13, %cst_14 [0] : vector<8x128xf32> to vector<128xf32>
    %15 = vector.shape_cast %14 : vector<128xf32> to vector<1x128xf32>
    %cst_15 = arith.constant 8.000000e+00 : f32
    %16 = vector.broadcast %cst_15 : f32 to vector<1x128xf32>
    %17 = arith.divf %15, %16 : vector<1x128xf32>
    %18 = arith.mulf %13, %13 : vector<8x128xf32>
    %cst_16 = arith.constant dense<0.000000e+00> : vector<128xf32>
    %19 = vector.multi_reduction <add>, %18, %cst_16 [0] : vector<8x128xf32> to vector<128xf32>
    %20 = vector.shape_cast %19 : vector<128xf32> to vector<1x128xf32>
    %cst_17 = arith.constant 8.000000e+00 : f32
    %21 = vector.broadcast %cst_17 : f32 to vector<1x128xf32>
    %22 = arith.divf %20, %21 : vector<1x128xf32>
    %23 = arith.mulf %17, %17 : vector<1x128xf32>
    %24 = arith.subf %22, %23 : vector<1x128xf32>
    %c1 = arith.constant 1 : index
    %c0_18 = arith.constant 0 : index
    %25 = vector.load %arg2[%c1, %c0_18] : memref<16x128xf32, #tpu.memory_space<vmem>>, vector<1x128xf32>
    %cst_19 = arith.constant 9.99999974E-6 : f32
    %26 = vector.broadcast %cst_19 : f32 to vector<1x128xf32>
    %27 = arith.addf %24, %26 : vector<1x128xf32>
    %28 = math.rsqrt %27 : vector<1x128xf32>
    %29 = arith.mulf %25, %28 : vector<1x128xf32>
    %c2 = arith.constant 2 : index
    %c0_20 = arith.constant 0 : index
    %30 = vector.load %arg2[%c2, %c0_20] : memref<16x128xf32, #tpu.memory_space<vmem>>, vector<1x128xf32>
    %31 = arith.mulf %17, %29 : vector<1x128xf32>
    %32 = arith.subf %30, %31 : vector<1x128xf32>
    %33 = vector.broadcast %29 : vector<1x128xf32> to vector<8x128xf32>
    %34 = arith.mulf %13, %33 : vector<8x128xf32>
    %35 = vector.broadcast %32 : vector<1x128xf32> to vector<8x128xf32>
    %36 = arith.addf %34, %35 : vector<8x128xf32>
    %37 = arith.truncf %36 : vector<8x128xf32> to vector<8x128xbf16>
    %c1_21 = arith.constant 1 : index
    %c0_22 = arith.constant 0 : index
    %c0_23 = arith.constant 0 : index
    %38 = vector.load %arg1[%c1_21, %c0_22, %c0_23] : memref<8x128x128xbf16, #tpu.memory_space<vmem>>, vector<1x128x128xbf16>
    %39 = vector.shape_cast %38 : vector<1x128x128xbf16> to vector<128x128xbf16>
    %cst_24 = arith.constant dense<0.000000e+00> : vector<8x128xf32>
    %40 = tpu.matmul %37, %39, %cst_24 {dimension_numbers = #tpu.dot_dimension_numbers<[1], [0], [0], [1], [0, 0, 1, 1], [], []>} : vector<8x128xbf16>, vector<128x128xbf16>, vector<8x128xf32> -> vector<8x128xf32>
    %c3 = arith.constant 3 : index
    %c0_25 = arith.constant 0 : index
    %41 = vector.load %arg2[%c3, %c0_25] : memref<16x128xf32, #tpu.memory_space<vmem>>, vector<1x128xf32>
    %42 = vector.broadcast %41 : vector<1x128xf32> to vector<8x128xf32>
    %43 = arith.addf %40, %42 : vector<8x128xf32>
    %cst_26 = arith.constant 0.000000e+00 : f32
    %44 = vector.broadcast %cst_26 : f32 to vector<8x128xf32>
    %45 = arith.maximumf %43, %44 : vector<8x128xf32>
    %46 = arith.truncf %45 : vector<8x128xf32> to vector<8x128xbf16>
    %c1_27 = arith.constant 1 : index
    %c0_28 = arith.constant 0 : index
    %c0_29 = arith.constant 0 : index
    %47 = vector.load %arg1[%c1_27, %c0_28, %c0_29] : memref<8x128x128xbf16, #tpu.memory_space<vmem>>, vector<1x128x128xbf16>
    %48 = vector.shape_cast %47 : vector<1x128x128xbf16> to vector<128x128xbf16>
    %cst_30 = arith.constant dense<0.000000e+00> : vector<8x128xf32>
    %49 = tpu.matmul %46, %48, %cst_30 {dimension_numbers = #tpu.dot_dimension_numbers<[1], [0], [0], [1], [0, 0, 1, 1], [], []>} : vector<8x128xbf16>, vector<128x128xbf16>, vector<8x128xf32> -> vector<8x128xf32>
    %c3_31 = arith.constant 3 : index
    %c0_32 = arith.constant 0 : index
    %50 = vector.load %arg2[%c3_31, %c0_32] : memref<16x128xf32, #tpu.memory_space<vmem>>, vector<1x128xf32>
    %51 = vector.broadcast %50 : vector<1x128xf32> to vector<8x128xf32>
    %52 = arith.addf %49, %51 : vector<8x128xf32>
    %53 = arith.addf %36, %52 : vector<8x128xf32>
    %cst_33 = arith.constant 0.000000e+00 : f32
    %54 = vector.broadcast %cst_33 : f32 to vector<8x128xf32>
    %55 = arith.maximumf %53, %54 : vector<8x128xf32>
    %56 = arith.truncf %55 : vector<8x128xf32> to vector<8x128xbf16>
    %c2_34 = arith.constant 2 : index
    %c0_35 = arith.constant 0 : index
    %c0_36 = arith.constant 0 : index
    %57 = vector.load %arg1[%c2_34, %c0_35, %c0_36] : memref<8x128x128xbf16, #tpu.memory_space<vmem>>, vector<1x128x128xbf16>
    %58 = vector.shape_cast %57 : vector<1x128x128xbf16> to vector<128x128xbf16>
    %cst_37 = arith.constant dense<0.000000e+00> : vector<8x128xf32>
    %59 = tpu.matmul %56, %58, %cst_37 {dimension_numbers = #tpu.dot_dimension_numbers<[1], [0], [0], [1], [0, 0, 1, 1], [], []>} : vector<8x128xbf16>, vector<128x128xbf16>, vector<8x128xf32> -> vector<8x128xf32>
    %c4 = arith.constant 4 : index
    %c0_38 = arith.constant 0 : index
    %60 = vector.load %arg2[%c4, %c0_38] : memref<16x128xf32, #tpu.memory_space<vmem>>, vector<1x128xf32>
    %61 = vector.broadcast %60 : vector<1x128xf32> to vector<8x128xf32>
    %62 = arith.addf %59, %61 : vector<8x128xf32>
    %cst_39 = arith.constant 0.000000e+00 : f32
    %63 = vector.broadcast %cst_39 : f32 to vector<8x128xf32>
    %64 = arith.maximumf %62, %63 : vector<8x128xf32>
    %cst_40 = arith.constant dense<0.000000e+00> : vector<128xf32>
    %65 = vector.multi_reduction <add>, %64, %cst_40 [0] : vector<8x128xf32> to vector<128xf32>
    %66 = vector.shape_cast %65 : vector<128xf32> to vector<1x128xf32>
    %cst_41 = arith.constant 8.000000e+00 : f32
    %67 = vector.broadcast %cst_41 : f32 to vector<1x128xf32>
    %68 = arith.divf %66, %67 : vector<1x128xf32>
    %69 = arith.mulf %64, %64 : vector<8x128xf32>
    %cst_42 = arith.constant dense<0.000000e+00> : vector<128xf32>
    %70 = vector.multi_reduction <add>, %69, %cst_42 [0] : vector<8x128xf32> to vector<128xf32>
    %71 = vector.shape_cast %70 : vector<128xf32> to vector<1x128xf32>
    %cst_43 = arith.constant 8.000000e+00 : f32
    %72 = vector.broadcast %cst_43 : f32 to vector<1x128xf32>
    %73 = arith.divf %71, %72 : vector<1x128xf32>
    %74 = arith.mulf %68, %68 : vector<1x128xf32>
    %75 = arith.subf %73, %74 : vector<1x128xf32>
    %c5 = arith.constant 5 : index
    %c0_44 = arith.constant 0 : index
    %76 = vector.load %arg2[%c5, %c0_44] : memref<16x128xf32, #tpu.memory_space<vmem>>, vector<1x128xf32>
    %cst_45 = arith.constant 9.99999974E-6 : f32
    %77 = vector.broadcast %cst_45 : f32 to vector<1x128xf32>
    %78 = arith.addf %75, %77 : vector<1x128xf32>
    %79 = math.rsqrt %78 : vector<1x128xf32>
    %80 = arith.mulf %76, %79 : vector<1x128xf32>
    %c6 = arith.constant 6 : index
    %c0_46 = arith.constant 0 : index
    %81 = vector.load %arg2[%c6, %c0_46] : memref<16x128xf32, #tpu.memory_space<vmem>>, vector<1x128xf32>
    %82 = arith.mulf %68, %80 : vector<1x128xf32>
    %83 = arith.subf %81, %82 : vector<1x128xf32>
    %84 = vector.broadcast %80 : vector<1x128xf32> to vector<8x128xf32>
    %85 = arith.mulf %64, %84 : vector<8x128xf32>
    %86 = vector.broadcast %83 : vector<1x128xf32> to vector<8x128xf32>
    %87 = arith.addf %85, %86 : vector<8x128xf32>
    %88 = arith.truncf %87 : vector<8x128xf32> to vector<8x128xbf16>
    %c3_47 = arith.constant 3 : index
    %c0_48 = arith.constant 0 : index
    %c0_49 = arith.constant 0 : index
    %89 = vector.load %arg1[%c3_47, %c0_48, %c0_49] : memref<8x128x128xbf16, #tpu.memory_space<vmem>>, vector<1x128x128xbf16>
    %90 = vector.shape_cast %89 : vector<1x128x128xbf16> to vector<128x128xbf16>
    %cst_50 = arith.constant dense<0.000000e+00> : vector<8x128xf32>
    %91 = tpu.matmul %88, %90, %cst_50 {dimension_numbers = #tpu.dot_dimension_numbers<[1], [0], [0], [1], [0, 0, 1, 1], [], []>} : vector<8x128xbf16>, vector<128x128xbf16>, vector<8x128xf32> -> vector<8x128xf32>
    %c7 = arith.constant 7 : index
    %c0_51 = arith.constant 0 : index
    %92 = vector.load %arg2[%c7, %c0_51] : memref<16x128xf32, #tpu.memory_space<vmem>>, vector<1x128xf32>
    %93 = vector.broadcast %92 : vector<1x128xf32> to vector<8x128xf32>
    %94 = arith.addf %91, %93 : vector<8x128xf32>
    %cst_52 = arith.constant 0.000000e+00 : f32
    %95 = vector.broadcast %cst_52 : f32 to vector<8x128xf32>
    %96 = arith.maximumf %94, %95 : vector<8x128xf32>
    %97 = arith.truncf %96 : vector<8x128xf32> to vector<8x128xbf16>
    %c3_53 = arith.constant 3 : index
    %c0_54 = arith.constant 0 : index
    %c0_55 = arith.constant 0 : index
    %98 = vector.load %arg1[%c3_53, %c0_54, %c0_55] : memref<8x128x128xbf16, #tpu.memory_space<vmem>>, vector<1x128x128xbf16>
    %99 = vector.shape_cast %98 : vector<1x128x128xbf16> to vector<128x128xbf16>
    %cst_56 = arith.constant dense<0.000000e+00> : vector<8x128xf32>
    %100 = tpu.matmul %97, %99, %cst_56 {dimension_numbers = #tpu.dot_dimension_numbers<[1], [0], [0], [1], [0, 0, 1, 1], [], []>} : vector<8x128xbf16>, vector<128x128xbf16>, vector<8x128xf32> -> vector<8x128xf32>
    %c7_57 = arith.constant 7 : index
    %c0_58 = arith.constant 0 : index
    %101 = vector.load %arg2[%c7_57, %c0_58] : memref<16x128xf32, #tpu.memory_space<vmem>>, vector<1x128xf32>
    %102 = vector.broadcast %101 : vector<1x128xf32> to vector<8x128xf32>
    %103 = arith.addf %100, %102 : vector<8x128xf32>
    %104 = arith.addf %87, %103 : vector<8x128xf32>
    %cst_59 = arith.constant 0.000000e+00 : f32
    %105 = vector.broadcast %cst_59 : f32 to vector<8x128xf32>
    %106 = arith.maximumf %104, %105 : vector<8x128xf32>
    %107 = arith.truncf %106 : vector<8x128xf32> to vector<8x128xbf16>
    %c4_60 = arith.constant 4 : index
    %c0_61 = arith.constant 0 : index
    %c0_62 = arith.constant 0 : index
    %108 = vector.load %arg1[%c4_60, %c0_61, %c0_62] : memref<8x128x128xbf16, #tpu.memory_space<vmem>>, vector<1x128x128xbf16>
    %109 = vector.shape_cast %108 : vector<1x128x128xbf16> to vector<128x128xbf16>
    %cst_63 = arith.constant dense<0.000000e+00> : vector<8x128xf32>
    %110 = tpu.matmul %107, %109, %cst_63 {dimension_numbers = #tpu.dot_dimension_numbers<[1], [0], [0], [1], [0, 0, 1, 1], [], []>} : vector<8x128xbf16>, vector<128x128xbf16>, vector<8x128xf32> -> vector<8x128xf32>
    %c8 = arith.constant 8 : index
    %c0_64 = arith.constant 0 : index
    %111 = vector.load %arg2[%c8, %c0_64] : memref<16x128xf32, #tpu.memory_space<vmem>>, vector<1x128xf32>
    %112 = vector.broadcast %111 : vector<1x128xf32> to vector<8x128xf32>
    %113 = arith.addf %110, %112 : vector<8x128xf32>
    %cst_65 = arith.constant 0.000000e+00 : f32
    %114 = vector.broadcast %cst_65 : f32 to vector<8x128xf32>
    %115 = arith.maximumf %113, %114 : vector<8x128xf32>
    %cst_66 = arith.constant dense<0.000000e+00> : vector<128xf32>
    %116 = vector.multi_reduction <add>, %115, %cst_66 [0] : vector<8x128xf32> to vector<128xf32>
    %117 = vector.shape_cast %116 : vector<128xf32> to vector<1x128xf32>
    %cst_67 = arith.constant 8.000000e+00 : f32
    %118 = vector.broadcast %cst_67 : f32 to vector<1x128xf32>
    %119 = arith.divf %117, %118 : vector<1x128xf32>
    %120 = arith.mulf %115, %115 : vector<8x128xf32>
    %cst_68 = arith.constant dense<0.000000e+00> : vector<128xf32>
    %121 = vector.multi_reduction <add>, %120, %cst_68 [0] : vector<8x128xf32> to vector<128xf32>
    %122 = vector.shape_cast %121 : vector<128xf32> to vector<1x128xf32>
    %cst_69 = arith.constant 8.000000e+00 : f32
    %123 = vector.broadcast %cst_69 : f32 to vector<1x128xf32>
    %124 = arith.divf %122, %123 : vector<1x128xf32>
    %125 = arith.mulf %119, %119 : vector<1x128xf32>
    %126 = arith.subf %124, %125 : vector<1x128xf32>
    %c9 = arith.constant 9 : index
    %c0_70 = arith.constant 0 : index
    %127 = vector.load %arg2[%c9, %c0_70] : memref<16x128xf32, #tpu.memory_space<vmem>>, vector<1x128xf32>
    %cst_71 = arith.constant 9.99999974E-6 : f32
    %128 = vector.broadcast %cst_71 : f32 to vector<1x128xf32>
    %129 = arith.addf %126, %128 : vector<1x128xf32>
    %130 = math.rsqrt %129 : vector<1x128xf32>
    %131 = arith.mulf %127, %130 : vector<1x128xf32>
    %c10 = arith.constant 10 : index
    %c0_72 = arith.constant 0 : index
    %132 = vector.load %arg2[%c10, %c0_72] : memref<16x128xf32, #tpu.memory_space<vmem>>, vector<1x128xf32>
    %133 = arith.mulf %119, %131 : vector<1x128xf32>
    %134 = arith.subf %132, %133 : vector<1x128xf32>
    %135 = vector.broadcast %131 : vector<1x128xf32> to vector<8x128xf32>
    %136 = arith.mulf %115, %135 : vector<8x128xf32>
    %137 = vector.broadcast %134 : vector<1x128xf32> to vector<8x128xf32>
    %138 = arith.addf %136, %137 : vector<8x128xf32>
    %139 = arith.truncf %138 : vector<8x128xf32> to vector<8x128xbf16>
    %c5_73 = arith.constant 5 : index
    %c0_74 = arith.constant 0 : index
    %c0_75 = arith.constant 0 : index
    %140 = vector.load %arg1[%c5_73, %c0_74, %c0_75] : memref<8x128x128xbf16, #tpu.memory_space<vmem>>, vector<1x128x128xbf16>
    %141 = vector.shape_cast %140 : vector<1x128x128xbf16> to vector<128x128xbf16>
    %cst_76 = arith.constant dense<0.000000e+00> : vector<8x128xf32>
    %142 = tpu.matmul %139, %141, %cst_76 {dimension_numbers = #tpu.dot_dimension_numbers<[1], [0], [0], [1], [0, 0, 1, 1], [], []>} : vector<8x128xbf16>, vector<128x128xbf16>, vector<8x128xf32> -> vector<8x128xf32>
    %c11 = arith.constant 11 : index
    %c0_77 = arith.constant 0 : index
    %143 = vector.load %arg2[%c11, %c0_77] : memref<16x128xf32, #tpu.memory_space<vmem>>, vector<1x128xf32>
    %144 = vector.broadcast %143 : vector<1x128xf32> to vector<8x128xf32>
    %145 = arith.addf %142, %144 : vector<8x128xf32>
    %cst_78 = arith.constant 0.000000e+00 : f32
    %146 = vector.broadcast %cst_78 : f32 to vector<8x128xf32>
    %147 = arith.maximumf %145, %146 : vector<8x128xf32>
    %148 = arith.truncf %147 : vector<8x128xf32> to vector<8x128xbf16>
    %c5_79 = arith.constant 5 : index
    %c0_80 = arith.constant 0 : index
    %c0_81 = arith.constant 0 : index
    %149 = vector.load %arg1[%c5_79, %c0_80, %c0_81] : memref<8x128x128xbf16, #tpu.memory_space<vmem>>, vector<1x128x128xbf16>
    %150 = vector.shape_cast %149 : vector<1x128x128xbf16> to vector<128x128xbf16>
    %cst_82 = arith.constant dense<0.000000e+00> : vector<8x128xf32>
    %151 = tpu.matmul %148, %150, %cst_82 {dimension_numbers = #tpu.dot_dimension_numbers<[1], [0], [0], [1], [0, 0, 1, 1], [], []>} : vector<8x128xbf16>, vector<128x128xbf16>, vector<8x128xf32> -> vector<8x128xf32>
    %c11_83 = arith.constant 11 : index
    %c0_84 = arith.constant 0 : index
    %152 = vector.load %arg2[%c11_83, %c0_84] : memref<16x128xf32, #tpu.memory_space<vmem>>, vector<1x128xf32>
    %153 = vector.broadcast %152 : vector<1x128xf32> to vector<8x128xf32>
    %154 = arith.addf %151, %153 : vector<8x128xf32>
    %155 = arith.addf %138, %154 : vector<8x128xf32>
    %cst_85 = arith.constant 0.000000e+00 : f32
    %156 = vector.broadcast %cst_85 : f32 to vector<8x128xf32>
    %157 = arith.maximumf %155, %156 : vector<8x128xf32>
    %158 = arith.truncf %157 : vector<8x128xf32> to vector<8x128xbf16>
    %c6_86 = arith.constant 6 : index
    %c0_87 = arith.constant 0 : index
    %c0_88 = arith.constant 0 : index
    %159 = vector.load %arg1[%c6_86, %c0_87, %c0_88] : memref<8x128x128xbf16, #tpu.memory_space<vmem>>, vector<1x128x128xbf16>
    %160 = vector.shape_cast %159 : vector<1x128x128xbf16> to vector<128x128xbf16>
    %cst_89 = arith.constant dense<0.000000e+00> : vector<8x128xf32>
    %161 = tpu.matmul %158, %160, %cst_89 {dimension_numbers = #tpu.dot_dimension_numbers<[1], [0], [0], [1], [0, 0, 1, 1], [], []>} : vector<8x128xbf16>, vector<128x128xbf16>, vector<8x128xf32> -> vector<8x128xf32>
    %c12 = arith.constant 12 : index
    %c0_90 = arith.constant 0 : index
    %162 = vector.load %arg2[%c12, %c0_90] : memref<16x128xf32, #tpu.memory_space<vmem>>, vector<1x128xf32>
    %163 = vector.broadcast %162 : vector<1x128xf32> to vector<8x128xf32>
    %164 = arith.addf %161, %163 : vector<8x128xf32>
    %cst_91 = arith.constant 0.000000e+00 : f32
    %165 = vector.broadcast %cst_91 : f32 to vector<8x128xf32>
    %166 = arith.maximumf %164, %165 : vector<8x128xf32>
    %167 = arith.truncf %166 : vector<8x128xf32> to vector<8x128xbf16>
    %c7_92 = arith.constant 7 : index
    %c0_93 = arith.constant 0 : index
    %c0_94 = arith.constant 0 : index
    %168 = vector.load %arg1[%c7_92, %c0_93, %c0_94] : memref<8x128x128xbf16, #tpu.memory_space<vmem>>, vector<1x128x128xbf16>
    %169 = vector.shape_cast %168 : vector<1x128x128xbf16> to vector<128x128xbf16>
    %cst_95 = arith.constant dense<0.000000e+00> : vector<8x128xf32>
    %170 = tpu.matmul %167, %169, %cst_95 {dimension_numbers = #tpu.dot_dimension_numbers<[1], [0], [0], [1], [0, 0, 1, 1], [], []>} : vector<8x128xbf16>, vector<128x128xbf16>, vector<8x128xf32> -> vector<8x128xf32>
    %c13 = arith.constant 13 : index
    %c0_96 = arith.constant 0 : index
    %171 = vector.load %arg2[%c13, %c0_96] : memref<16x128xf32, #tpu.memory_space<vmem>>, vector<1x128xf32>
    %172 = vector.broadcast %171 : vector<1x128xf32> to vector<8x128xf32>
    %173 = arith.addf %170, %172 : vector<8x128xf32>
    %c0_97 = arith.constant 0 : index
    %c0_98 = arith.constant 0 : index
    %174 = vector.load %arg3[%c0_97, %c0_98] : memref<8x128xf32, #tpu.memory_space<vmem>>, vector<8x128xf32>
    tpu.vector_store %arg3[%c0_97, %c0_98], %173 {strides = array<i32>} : memref<8x128xf32, #tpu.memory_space<vmem>>, vector<8x128xf32>,
    return
  }
}

</mosaic_0001>

<bundles_post_ra>
// kernel: tbresnet_forward.1
= control target key start
LH: loop header
LB: loop body
LE: loop exit
PB: predicated region body
PF: predicated region fallthrough
CT: control target
= control target key end

     0   :  { %8 = vsyncpa [#allocation4], 0  ;;  %s1886_s0 = inlined_call_operand.hbm [shape: f32[8,32], index: 0, kind: input, shape index: {}]   ;;  %s1887_s1 = inlined_call_operand.hbm [shape: bf16[8,128,128], index: 1, kind: input, shape index: {}]   ;;  %s1888_s2 = inlined_call_operand.hbm [shape: f32[16,128], index: 2, kind: input, shape index: {}]   ;;  %s1889_s3 = inlined_call_operand.vmem [shape: f32[8,128], index: 3, kind: output, shape index: {}]  }
   0x1   :  { %9 = vsyncpa [#allocation6], 0  ;;  %s1726_s12 = smov [#allocation5]  }
   0x2   :  { %s25_s13 = sshll.u32 %s1726_s12, 4  ;;  %s26_s13 = int_to_ptr.vmem [resolvable:$true] %s25_s13 }
   0x3   :  { %s1670_s14 = scalar_lea.vmem %s26_s13, 8192  ;;  %p1675_p1 = scmp.lt.s32.totalorder %s26_s13, %s26_s13 }
   0x4   :  { %p1671_p0 = scmp.ne.s32.totalorder %s26_s13, %s1670_s14  ;;  %p1676_p2 = scmp.lt.s32.totalorder %s1670_s14, %s1670_s14 }
   0x6   :  { %p1677_p3 = por %p1676_p2, %p1675_p1 }
   0x8   :  { %p1678_p4 = pnand %p1677_p3, %p1671_p0 }
   0xa   :  { %1681 = shalt.err (!%p1678_p4)
}
   0xb   :  { %s1727_s15 = smov 64   ;;  %s1728_s16 = smov 4  }
   0xc   :  { %31 = dma.hbm_to_vmem [thread:$0]  %s1887_s1, 8192, %s26_s13, [#allocation6], %s1727_s15, %s1727_s15, %s1728_s16  }
   0xd   :  { %s1729_s19 = smov [#allocation3]   ;;  %s1730_s21 = smov [#allocation7]  }
   0xe   :  { %s16_s20 = sshll.u32 %s1729_s19, 4  ;;  %s37_s22 = sshll.u32 %s1730_s21, 4  ;;  %s17_s20 = int_to_ptr.vmem [resolvable:$true] %s16_s20  ;;  %s38_s22 = int_to_ptr.vmem [resolvable:$true] %s37_s22 }
   0xf   :  { %s1690_s23 = scalar_lea.vmem %s17_s20, 128  ;;  %p1695_p6 = scmp.lt.s32.totalorder %s17_s20, %s17_s20 }
  0x10   :  { %p1691_p5 = scmp.ne.s32.totalorder %s17_s20, %s1690_s23  ;;  %p1696_p7 = scmp.lt.s32.totalorder %s1690_s23, %s1690_s23 }
  0x12   :  { %p1697_p8 = por %p1696_p7, %p1695_p6 }
  0x14   :  { %p1698_p9 = pnand %p1697_p8, %p1691_p5 }
  0x16   :  { %1701 = shalt.err (!%p1698_p9)
}
  0x17   :  { %19 = dma.hbm_to_vmem [thread:$0]  %s1886_s0, 128, %s17_s20, [#allocation4]  }
  0x18   :  { %s1710_s26 = scalar_lea.vmem %s38_s22, 256  ;;  %p1715_p11 = scmp.lt.s32.totalorder %s38_s22, %s38_s22 }
  0x19   :  { %p1711_p10 = scmp.ne.s32.totalorder %s38_s22, %s1710_s26  ;;  %p1716_p12 = scmp.lt.s32.totalorder %s1710_s26, %s1710_s26 }
  0x1b   :  { %p1717_p13 = por %p1716_p12, %p1715_p11 }
  0x1d   :  { %p1718_p0 = pnand %p1717_p13, %p1711_p10 }
  0x1f   :  { %1721 = shalt.err (!%p1718_p0)
}
  0x20   :  { %s1731_s1 = smov 128   ;;  %s1732_s27 = smov 8  }
  0x21   :  { %43 = dma.hbm_to_vmem [thread:$0]  %s1888_s2, 256, %s38_s22, [#allocation6], %s1731_s1, %s1731_s1, %s1732_s27  }
  0x22   :  { %1722 = dma.done.wait [#allocation4], 128  }
  0x23   :  { %1723 = vsyncadd [#allocation4], 4294967168 }
  0x24   :  { %1724 = dma.done.wait [#allocation6], 8448  }
  0x25   :  { %1725 = vsyncadd [#allocation6], 4294958848  ;;  %v1733_v0 = vmov 0.0   ;;  %vm1734_vm0 = vmmov 0   ;;  %v1592_v1 = vld [vmem:[#allocation5 + $0x38] sm:$0xff]   ;;  %v1593_v2 = vld [vmem:[#allocation5 + $0x30] sm:$0xff]   ;;  %v195_v45 = vlaneseq }
  0x26   :  { %1363 = vmatprep.subr.bf16.mxu0 %v1733_v0  ;;  %54 = vst [vmem:[#allocation2] sm:$0xff] %v1733_v0  ;;  %1379 = vmatprep.mubr.msk.bf16.mxu0 %vm1734_vm0, %v1733_v0  ;;  %v1594_v3 = vld [vmem:[#allocation5 + $0x28] sm:$0xff]   ;;  %vm56_vm1 = vcmask 261120   ;;  %v1595_v4 = vld [vmem:[#allocation5 + $0x20] sm:$0xff]   ;;  %v55_v5 = vld [vmem:[#allocation3] sm:$0xff] }
  0x27   :  { %1383 = vmatprep.subr.bf16.mxu1 %v1733_v0  ;;  %1399 = vmatprep.mubr.msk.bf16.mxu1 %vm1734_vm0, %v1733_v0  ;;  %57 = vst.msk [vmem:[#allocation2] sm:$0xff] %vm56_vm1, %v55_v5  ;;  %v1596_v6 = vld [vmem:[#allocation5 + $0x18] sm:$0xff]   ;;  %v1597_v7 = vld [vmem:[#allocation5 + $0x10] sm:$0xff]   ;;  %v1598_v8 = vld [vmem:[#allocation5 + $0x8] sm:$0xff]   ;;  %v196_v46 = vshrl.u32 %v195_v45, 7 }
  0x28   :  { %1364 = vmatpush3.bf16.msra.mxu0 %v1592_v1  ;;  %v1599_v9 = vld [vmem:[#allocation5] sm:$0xff]   ;;  %v1600_v12 = vld [vmem:[#allocation5 + $0x78] sm:$0xff]   ;;  %v1601_v13 = vld [vmem:[#allocation5 + $0x70] sm:$0xff]  }
  0x29   :  { %1365 = vmatprep.subr.bf16.mxu0 %v1733_v0  ;;  %1384 = vmatpush3.bf16.msra.mxu1 %v1600_v12  ;;  %v1602_v14 = vld [vmem:[#allocation5 + $0x68] sm:$0xff]   ;;  %v1603_v15 = vld [vmem:[#allocation5 + $0x60] sm:$0xff]   ;;  %v1604_v16 = vld [vmem:[#allocation5 + $0x58] sm:$0xff]   ;;  %v1797_v48 = vsub.s32 0, %v196_v46 }
  0x2a   :  { %1385 = vmatprep.subr.bf16.mxu1 %v1733_v0  ;;  %v1605_v17 = vld [vmem:[#allocation5 + $0x50] sm:$0xff]   ;;  %v1606_v18 = vld [vmem:[#allocation5 + $0x48] sm:$0xff]   ;;  %v1607_v19 = vld [vmem:[#allocation5 + $0x40] sm:$0xff]  }
  0x2b   :  { %v1192_v20 = vld [vmem:[#allocation7] ss:$0 sm:$0xff]  ;;  %v188_v47 = vld [vmem:[#allocation7 + $0x1] sm:$0x1]  ;;  %v192_v51 = vld [vmem:[#allocation7 + $0x2] sm:$0x1] }
  0x2c   :  { %1366 = vmatpush3.bf16.msra.mxu0 %v1593_v2  ;;  %v1608_v59 = vld [vmem:[#allocation5 + $0xb8] sm:$0xff]   ;;  %v1609_v60 = vld [vmem:[#allocation5 + $0xb0] sm:$0xff]   ;;  %v1610_v61 = vld [vmem:[#allocation5 + $0xa8] sm:$0xff]  }
  0x2d   :  { %1367 = vmatprep.subr.bf16.mxu0 %v1733_v0  ;;  %1386 = vmatpush3.bf16.msra.mxu1 %v1601_v13  ;;  %v1611_v62 = vld [vmem:[#allocation5 + $0xa0] sm:$0xff]   ;;  %v1612_v63 = vld [vmem:[#allocation5 + $0x98] sm:$0xff]   ;;  %v1613_v1 = vld [vmem:[#allocation5 + $0x90] sm:$0xff]  }
  0x2e   :  { %v58_v10 = vld [vmem:[#allocation2] sm:$0xff]  ;;  %1387 = vmatprep.subr.bf16.mxu1 %v1733_v0  ;;  %v1201_v2 = vld [vmem:[#allocation7 + $0x3] ss:$0 sm:$0xff] }
  0x2f   :  { %v59_v11 = vpack.c.bf16 %v58_v10, %v58_v10  ;;  %v1614_v10 = vld [vmem:[#allocation5 + $0x88] sm:$0xff]  }
  0x30   :  { %1368 = vmatpush3.bf16.msra.mxu0 %v1594_v3 }
  0x31   :  { %1369 = vmatprep.subr.bf16.mxu0 %v1733_v0  ;;  %1388 = vmatpush3.bf16.msra.mxu1 %v1602_v14 }
  0x32   :  { %1389 = vmatprep.subr.bf16.mxu1 %v1733_v0 }
  0x34   :  { %1370 = vmatpush3.bf16.msra.mxu0 %v1595_v4 }
  0x35   :  { %1371 = vmatprep.subr.bf16.mxu0 %v1733_v0  ;;  %1390 = vmatpush3.bf16.msra.mxu1 %v1603_v15 }
  0x36   :  { %1391 = vmatprep.subr.bf16.mxu1 %v1733_v0 }
  0x38   :  { %1372 = vmatpush3.bf16.msra.mxu0 %v1596_v6 }
  0x39   :  { %1373 = vmatprep.subr.bf16.mxu0 %v1733_v0  ;;  %1392 = vmatpush3.bf16.msra.mxu1 %v1604_v16 }
  0x3a   :  { %1393 = vmatprep.subr.bf16.mxu1 %v1733_v0 }
  0x3c   :  { %1374 = vmatpush3.bf16.msra.mxu0 %v1597_v7 }
  0x3d   :  { %1375 = vmatprep.subr.bf16.mxu0 %v1733_v0  ;;  %1394 = vmatpush3.bf16.msra.mxu1 %v1605_v17 }
  0x3e   :  { %1395 = vmatprep.subr.bf16.mxu1 %v1733_v0 }
  0x40   :  { %1376 = vmatpush3.bf16.msra.mxu0 %v1598_v8 }
  0x41   :  { %1377 = vmatprep.subr.bf16.mxu0 %v1733_v0  ;;  %1396 = vmatpush3.bf16.msra.mxu1 %v1606_v18 }
  0x42   :  { %1397 = vmatprep.subr.bf16.mxu1 %v1733_v0 }
  0x44   :  { %1378 = vmatpush3.bf16.msra.mxu0 %v1599_v9 }
  0x45   :  { %1403 = vmatprep.subr.bf16.mxu0 %v1733_v0  ;;  %1398 = vmatpush3.bf16.msra.mxu1 %v1607_v19 }
  0x46   :  { %1423 = vmatprep.subr.bf16.mxu1 %v1733_v0 }
  0x47   :  { %1380 = vmatmul.mubr.bf16.vlgmr.msra.gmra.mxu0 %v59_v11  ;;  %v1615_v11 = vld [vmem:[#allocation5 + $0x80] sm:$0xff]  }
  0x48   :  { %1419 = vmatprep.mubr.msk.bf16.mxu0 %vm1734_vm0, %v1733_v0  ;;  %1404 = vmatpush3.bf16.msra.mxu0 %v1600_v12 }
  0x49   :  { %1405 = vmatprep.subr.bf16.mxu0 %v1733_v0 }
  0x4c   :  { %1406 = vmatpush3.bf16.msra.mxu0 %v1601_v13 }
  0x4d   :  { %1407 = vmatprep.subr.bf16.mxu0 %v1733_v0 }
  0x50   :  { %1408 = vmatpush3.bf16.msra.mxu0 %v1602_v14 }
  0x51   :  { %1409 = vmatprep.subr.bf16.mxu0 %v1733_v0 }
  0x54   :  { %1410 = vmatpush3.bf16.msra.mxu0 %v1603_v15 }
  0x55   :  { %1411 = vmatprep.subr.bf16.mxu0 %v1733_v0 }
  0x58   :  { %1412 = vmatpush3.bf16.msra.mxu0 %v1604_v16 }
  0x59   :  { %1413 = vmatprep.subr.bf16.mxu0 %v1733_v0 }
  0x5c   :  { %1414 = vmatpush3.bf16.msra.mxu0 %v1605_v17 }
  0x5d   :  { %1415 = vmatprep.subr.bf16.mxu0 %v1733_v0 }
  0x60   :  { %1416 = vmatpush3.bf16.msra.mxu0 %v1606_v18 }
  0x61   :  { %1417 = vmatprep.subr.bf16.mxu0 %v1733_v0 }
  0x64   :  { %1418 = vmatpush3.bf16.msra.mxu0 %v1607_v19 }
  0x65   :  { %1443 = vmatprep.subr.bf16.mxu0 %v1733_v0 }
 0x107   :  { %v163_v21 = vpop.f32.mrf.mxu0 }
 0x108   :  { %v164_v22 = vadd.f32 %v1192_v20, %v163_v21  ;;  %v1616_v20 = vld [vmem:[#allocation5 + $0xf8] sm:$0xff]   ;;  %v1617_v21 = vld [vmem:[#allocation5 + $0xf0] sm:$0xff]  }
 0x109   :  { %v1381_v23 = vpop.f32.mrf.mxu0 }
 0x10a   :  { %v169_v24 = vmax.f32 %v164_v22, 0.0  ;;  %v1618_v22 = vld [vmem:[#allocation5 + $0xe8] sm:$0xff]   ;;  %v1619_v23 = vld [vmem:[#allocation5 + $0xe0] sm:$0xff]  }
 0x10b   :  { %v166_v25 = vpop.f32.mrf.mxu0 }
 0x10c   :  { %v170_v26 = vrot.slane %v169_v24, 4  ;;  %v178_v27 = vmul.f32 %v169_v24, %v169_v24  ;;  %v1621_v25 = vld [vmem:[#allocation5 + $0xd0] sm:$0xff]  }
 0x10d   :  { %v1382_v28 = vpop.f32.mrf.mxu0 }
 0x10e   :  { %v171_v29 = vadd.f32 %v170_v26, %v169_v24  ;;  %v179_v30 = vrot.slane %v178_v27, 4  ;;  %v1622_v26 = vld [vmem:[#allocation5 + $0xc8] sm:$0xff]   ;;  %v1210_v28 = vld [vmem:[#allocation7 + $0x4] ss:$0 sm:$0xff] }
 0x110   :  { %v172_v31 = vrot.slane %v171_v29, 2  ;;  %v180_v32 = vadd.f32 %v179_v30, %v178_v27  ;;  %v1623_v27 = vld [vmem:[#allocation5 + $0xc0] sm:$0xff]  }
 0x112   :  { %v173_v33 = vadd.f32 %v172_v31, %v171_v29  ;;  %v181_v34 = vrot.slane %v180_v32, 2 }
 0x114   :  { %v174_v35 = vrot.slane %v173_v33, 1  ;;  %v182_v36 = vadd.f32 %v181_v34, %v180_v32 }
 0x116   :  { %v175_v37 = vadd.f32 %v174_v35, %v173_v33  ;;  %v183_v38 = vrot.slane %v182_v36, 1 }
 0x118   :  { %v177_v39 = vmul.f32 0.125, %v175_v37  ;;  %v184_v40 = vadd.f32 %v183_v38, %v182_v36 }
 0x11a   :  { %v185_v41 = vmul.f32 0.125, %v184_v40  ;;  %v186_v42 = vmul.f32 %v177_v39, %v177_v39 }
 0x11c   :  { %v187_v43 = vsub.f32 %v185_v41, %v186_v42 }
 0x11e   :  { %v189_v44 = vadd.f32 1e-05, %v187_v43 }
 0x120   :  { %1656 = vrsqrt.f32 %v189_v44 }
 0x12d   :  { %v1657_v49 = vpop.eup %1656 }
 0x12e   :  { %v191_v50 = vmul.f32 %v1657_v49, %v188_v47 }
 0x130   :  { %v193_v52 = vmul.f32 %v191_v50, %v177_v39  ;;  %v198_v53 = vrot.slane %v191_v50, %v1797_v48 }
 0x132   :  { %v194_v54 = vsub.f32 %v192_v51, %v193_v52  ;;  %v199_v55 = vmul.f32 %v198_v53, %v169_v24  ;;  %v1620_v24 = vld [vmem:[#allocation5 + $0xd8] sm:$0xff]  }
 0x134   :  { %v203_v56 = vrot.slane %v194_v54, %v1797_v48  ;;  %v489_v54 = vld [vmem:[#allocation7 + $0x5] sm:$0x1] }
 0x136   :  { %v204_v57 = vadd.f32 %v203_v56, %v199_v55 }
 0x138   :  { %v205_v58 = vpack.c.bf16 %v204_v57, %v204_v57 }
 0x13a   :  { %1400 = vmatmul.mubr.bf16.vlgmr.msra.gmra.mxu1 %v205_v58 }
 0x13b   :  { %1439 = vmatprep.mubr.msk.bf16.mxu1 %vm1734_vm0, %v1733_v0  ;;  %1424 = vmatpush3.bf16.msra.mxu1 %v1608_v59 }
 0x13c   :  { %1425 = vmatprep.subr.bf16.mxu1 %v1733_v0 }
 0x13f   :  { %1426 = vmatpush3.bf16.msra.mxu1 %v1609_v60 }
 0x140   :  { %1427 = vmatprep.subr.bf16.mxu1 %v1733_v0 }
 0x143   :  { %1428 = vmatpush3.bf16.msra.mxu1 %v1610_v61 }
 0x144   :  { %1429 = vmatprep.subr.bf16.mxu1 %v1733_v0 }
 0x147   :  { %1430 = vmatpush3.bf16.msra.mxu1 %v1611_v62 }
 0x148   :  { %1431 = vmatprep.subr.bf16.mxu1 %v1733_v0 }
 0x14b   :  { %1432 = vmatpush3.bf16.msra.mxu1 %v1612_v63 }
 0x14c   :  { %1433 = vmatprep.subr.bf16.mxu1 %v1733_v0 }
 0x14f   :  { %1434 = vmatpush3.bf16.msra.mxu1 %v1613_v1 }
 0x150   :  { %1435 = vmatprep.subr.bf16.mxu1 %v1733_v0 }
 0x153   :  { %1436 = vmatpush3.bf16.msra.mxu1 %v1614_v10 }
 0x154   :  { %1437 = vmatprep.subr.bf16.mxu1 %v1733_v0 }
 0x157   :  { %1438 = vmatpush3.bf16.msra.mxu1 %v1615_v11 }
 0x158   :  { %1463 = vmatprep.subr.bf16.mxu1 %v1733_v0 }
 0x1fa   :  { %v310_v3 = vpop.f32.mrf.mxu1 }
 0x1fb   :  { %v311_v4 = vadd.f32 %v1201_v2, %v310_v3  ;;  %v1625_v3 = vld [vmem:[#allocation5 + $0x130] sm:$0xff]  }
 0x1fc   :  { %v1401_v5 = vpop.f32.mrf.mxu1 }
 0x1fd   :  { %v316_v6 = vmax.f32 %v311_v4, 0.0  ;;  %v1626_v4 = vld [vmem:[#allocation5 + $0x128] sm:$0xff]   ;;  %v1627_v5 = vld [vmem:[#allocation5 + $0x120] sm:$0xff]  }
 0x1fe   :  { %v313_v7 = vpop.f32.mrf.mxu1 }
 0x1ff   :  { %v317_v8 = vpack.c.bf16 %v316_v6, %v316_v6  ;;  %v1628_v6 = vld [vmem:[#allocation5 + $0x118] sm:$0xff]   ;;  %v1629_v7 = vld [vmem:[#allocation5 + $0x110] sm:$0xff]  }
 0x200   :  { %v1402_v9 = vpop.f32.mrf.mxu1 }
 0x201   :  { %1420 = vmatmul.mubr.bf16.vlgmr.msra.gmra.mxu0 %v317_v8  ;;  %v1219_v8 = vld [vmem:[#allocation7 + $0x7] ss:$0 sm:$0xff] }
 0x202   :  { %1459 = vmatprep.mubr.msk.bf16.mxu0 %vm1734_vm0, %v1733_v0  ;;  %1444 = vmatpush3.bf16.msra.mxu0 %v1616_v20 }
 0x203   :  { %1445 = vmatprep.subr.bf16.mxu0 %v1733_v0 }
 0x206   :  { %1446 = vmatpush3.bf16.msra.mxu0 %v1617_v21 }
 0x207   :  { %1447 = vmatprep.subr.bf16.mxu0 %v1733_v0 }
 0x20a   :  { %1448 = vmatpush3.bf16.msra.mxu0 %v1618_v22 }
 0x20b   :  { %1449 = vmatprep.subr.bf16.mxu0 %v1733_v0 }
 0x20e   :  { %1450 = vmatpush3.bf16.msra.mxu0 %v1619_v23 }
 0x20f   :  { %1451 = vmatprep.subr.bf16.mxu0 %v1733_v0 }
 0x212   :  { %1452 = vmatpush3.bf16.msra.mxu0 %v1620_v24 }
 0x213   :  { %1453 = vmatprep.subr.bf16.mxu0 %v1733_v0 }
 0x216   :  { %1454 = vmatpush3.bf16.msra.mxu0 %v1621_v25 }
 0x217   :  { %1455 = vmatprep.subr.bf16.mxu0 %v1733_v0 }
 0x21a   :  { %1456 = vmatpush3.bf16.msra.mxu0 %v1622_v26 }
 0x21b   :  { %1457 = vmatprep.subr.bf16.mxu0 %v1733_v0 }
 0x21e   :  { %1458 = vmatpush3.bf16.msra.mxu0 %v1623_v27 }
 0x21f   :  { %1483 = vmatprep.subr.bf16.mxu0 %v1733_v0 }
 0x2c1   :  { %v352_v12 = vpop.f32.mrf.mxu0 }
 0x2c2   :  { %v353_v13 = vadd.f32 %v1201_v2, %v352_v12  ;;  %v1624_v2 = vld [vmem:[#allocation5 + $0x138] sm:$0xff]  }
 0x2c3   :  { %v1421_v14 = vpop.f32.mrf.mxu0 }
 0x2c4   :  { %v358_v15 = vadd.f32 %v353_v13, %v204_v57  ;;  %v493_v57 = vld [vmem:[#allocation7 + $0x6] sm:$0x1] }
 0x2c5   :  { %v355_v16 = vpop.f32.mrf.mxu0 }
 0x2c6   :  { %v359_v17 = vmax.f32 %v358_v15, 0.0  ;;  %v1630_v16 = vld [vmem:[#allocation5 + $0x108] sm:$0xff]  }
 0x2c7   :  { %v1422_v18 = vpop.f32.mrf.mxu0 }
 0x2c8   :  { %v360_v19 = vpack.c.bf16 %v359_v17, %v359_v17  ;;  %v1631_v17 = vld [vmem:[#allocation5 + $0x100] sm:$0xff]  }
 0x2ca   :  { %1440 = vmatmul.mubr.bf16.vlgmr.msra.gmra.mxu1 %v360_v19 }
 0x2cb   :  { %1479 = vmatprep.mubr.msk.bf16.mxu1 %vm1734_vm0, %v1733_v0  ;;  %1464 = vmatpush3.bf16.msra.mxu1 %v1616_v20 }
 0x2cc   :  { %1465 = vmatprep.subr.bf16.mxu1 %v1733_v0 }
 0x2cf   :  { %1466 = vmatpush3.bf16.msra.mxu1 %v1617_v21 }
 0x2d0   :  { %1467 = vmatprep.subr.bf16.mxu1 %v1733_v0 }
 0x2d3   :  { %1468 = vmatpush3.bf16.msra.mxu1 %v1618_v22 }
 0x2d4   :  { %1469 = vmatprep.subr.bf16.mxu1 %v1733_v0 }
 0x2d7   :  { %1470 = vmatpush3.bf16.msra.mxu1 %v1619_v23 }
 0x2d8   :  { %1471 = vmatprep.subr.bf16.mxu1 %v1733_v0 }
 0x2db   :  { %1472 = vmatpush3.bf16.msra.mxu1 %v1620_v24 }
 0x2dc   :  { %1473 = vmatprep.subr.bf16.mxu1 %v1733_v0 }
 0x2df   :  { %1474 = vmatpush3.bf16.msra.mxu1 %v1621_v25 }
 0x2e0   :  { %1475 = vmatprep.subr.bf16.mxu1 %v1733_v0 }
 0x2e3   :  { %1476 = vmatpush3.bf16.msra.mxu1 %v1622_v26  ;;  %v1632_v26 = vld [vmem:[#allocation5 + $0x178] sm:$0xff]  }
 0x2e4   :  { %1477 = vmatprep.subr.bf16.mxu1 %v1733_v0 }
 0x2e7   :  { %1478 = vmatpush3.bf16.msra.mxu1 %v1623_v27  ;;  %v1633_v27 = vld [vmem:[#allocation5 + $0x170] sm:$0xff]  }
 0x2e8   :  { %1503 = vmatprep.subr.bf16.mxu1 %v1733_v0 }
 0x38a   :  { %v465_v29 = vpop.f32.mrf.mxu1 }
 0x38b   :  { %v466_v30 = vadd.f32 %v1210_v28, %v465_v29  ;;  %v1634_v28 = vld [vmem:[#allocation5 + $0x168] sm:$0xff]   ;;  %v1635_v29 = vld [vmem:[#allocation5 + $0x160] sm:$0xff]  }
 0x38c   :  { %v1441_v31 = vpop.f32.mrf.mxu1 }
 0x38d   :  { %v471_v32 = vmax.f32 %v466_v30, 0.0  ;;  %v1636_v30 = vld [vmem:[#allocation5 + $0x158] sm:$0xff]   ;;  %v1637_v31 = vld [vmem:[#allocation5 + $0x150] sm:$0xff]  }
 0x38e   :  { %v468_v33 = vpop.f32.mrf.mxu1 }
 0x38f   :  { %v472_v34 = vrot.slane %v471_v32, 4  ;;  %v479_v35 = vmul.f32 %v471_v32, %v471_v32  ;;  %v1639_v33 = vld [vmem:[#allocation5 + $0x140] sm:$0xff]  }
 0x390   :  { %v1442_v36 = vpop.f32.mrf.mxu1 }
 0x391   :  { %v473_v37 = vadd.f32 %v472_v34, %v471_v32  ;;  %v480_v38 = vrot.slane %v479_v35, 4  ;;  %v1228_v34 = vld [vmem:[#allocation7 + $0x8] ss:$0 sm:$0xff] }
 0x393   :  { %v474_v39 = vrot.slane %v473_v37, 2  ;;  %v481_v40 = vadd.f32 %v480_v38, %v479_v35 }
 0x395   :  { %v475_v41 = vadd.f32 %v474_v39, %v473_v37  ;;  %v482_v42 = vrot.slane %v481_v40, 2 }
 0x397   :  { %v476_v43 = vrot.slane %v475_v41, 1  ;;  %v483_v44 = vadd.f32 %v482_v42, %v481_v40 }
 0x399   :  { %v477_v45 = vadd.f32 %v476_v43, %v475_v41  ;;  %v484_v46 = vrot.slane %v483_v44, 1 }
 0x39b   :  { %v478_v47 = vmul.f32 0.125, %v477_v45  ;;  %v485_v49 = vadd.f32 %v484_v46, %v483_v44 }
 0x39d   :  { %v486_v50 = vmul.f32 0.125, %v485_v49  ;;  %v487_v51 = vmul.f32 %v478_v47, %v478_v47 }
 0x39f   :  { %v488_v52 = vsub.f32 %v486_v50, %v487_v51 }
 0x3a1   :  { %v490_v53 = vadd.f32 1e-05, %v488_v52 }
 0x3a3   :  { %1658 = vrsqrt.f32 %v490_v53 }
 0x3b0   :  { %v1659_v55 = vpop.eup %1658 }
 0x3b1   :  { %v492_v56 = vmul.f32 %v1659_v55, %v489_v54 }
 0x3b3   :  { %v494_v58 = vmul.f32 %v492_v56, %v478_v47  ;;  %v499_v59 = vrot.slane %v492_v56, %v1797_v48 }
 0x3b5   :  { %v495_v60 = vsub.f32 %v493_v57, %v494_v58  ;;  %v500_v61 = vmul.f32 %v499_v59, %v471_v32  ;;  %v1638_v32 = vld [vmem:[#allocation5 + $0x148] sm:$0xff]  }
 0x3b7   :  { %v504_v62 = vrot.slane %v495_v60, %v1797_v48  ;;  %v790_v60 = vld [vmem:[#allocation7 + $0x9] sm:$0x1] }
 0x3b9   :  { %v505_v63 = vadd.f32 %v504_v62, %v500_v61 }
 0x3bb   :  { %v506_v1 = vpack.c.bf16 %v505_v63, %v505_v63 }
 0x3bd   :  { %1460 = vmatmul.mubr.bf16.vlgmr.msra.gmra.mxu0 %v506_v1 }
 0x3be   :  { %1499 = vmatprep.mubr.msk.bf16.mxu0 %vm1734_vm0, %v1733_v0  ;;  %1484 = vmatpush3.bf16.msra.mxu0 %v1624_v2 }
 0x3bf   :  { %1485 = vmatprep.subr.bf16.mxu0 %v1733_v0 }
 0x3c2   :  { %1486 = vmatpush3.bf16.msra.mxu0 %v1625_v3 }
 0x3c3   :  { %1487 = vmatprep.subr.bf16.mxu0 %v1733_v0 }
 0x3c6   :  { %1488 = vmatpush3.bf16.msra.mxu0 %v1626_v4 }
 0x3c7   :  { %1489 = vmatprep.subr.bf16.mxu0 %v1733_v0 }
 0x3ca   :  { %1490 = vmatpush3.bf16.msra.mxu0 %v1627_v5 }
 0x3cb   :  { %1491 = vmatprep.subr.bf16.mxu0 %v1733_v0 }
 0x3ce   :  { %1492 = vmatpush3.bf16.msra.mxu0 %v1628_v6 }
 0x3cf   :  { %1493 = vmatprep.subr.bf16.mxu0 %v1733_v0 }
 0x3d2   :  { %1494 = vmatpush3.bf16.msra.mxu0 %v1629_v7 }
 0x3d3   :  { %1495 = vmatprep.subr.bf16.mxu0 %v1733_v0 }
 0x3d6   :  { %1496 = vmatpush3.bf16.msra.mxu0 %v1630_v16 }
 0x3d7   :  { %1497 = vmatprep.subr.bf16.mxu0 %v1733_v0 }
 0x3da   :  { %1498 = vmatpush3.bf16.msra.mxu0 %v1631_v17 }
 0x3db   :  { %1523 = vmatprep.subr.bf16.mxu0 %v1733_v0 }
 0x47d   :  { %v611_v9 = vpop.f32.mrf.mxu0 }
 0x47e   :  { %v612_v10 = vadd.f32 %v1219_v8, %v611_v9  ;;  %v1641_v9 = vld [vmem:[#allocation5 + $0x1b0] sm:$0xff]  }
 0x47f   :  { %v1461_v11 = vpop.f32.mrf.mxu0 }
 0x480   :  { %v617_v12 = vmax.f32 %v612_v10, 0.0  ;;  %v1642_v10 = vld [vmem:[#allocation5 + $0x1a8] sm:$0xff]   ;;  %v1643_v11 = vld [vmem:[#allocation5 + $0x1a0] sm:$0xff]  }
 0x481   :  { %v614_v13 = vpop.f32.mrf.mxu0 }
 0x482   :  { %v618_v14 = vpack.c.bf16 %v617_v12, %v617_v12  ;;  %v1645_v12 = vld [vmem:[#allocation5 + $0x190] sm:$0xff]   ;;  %v1237_v13 = vld [vmem:[#allocation7 + $0xb] ss:$0 sm:$0xff] }
 0x483   :  { %v1462_v15 = vpop.f32.mrf.mxu0 }
 0x484   :  { %1480 = vmatmul.mubr.bf16.vlgmr.msra.gmra.mxu1 %v618_v14 }
 0x485   :  { %1519 = vmatprep.mubr.msk.bf16.mxu1 %vm1734_vm0, %v1733_v0  ;;  %1504 = vmatpush3.bf16.msra.mxu1 %v1632_v26 }
 0x486   :  { %1505 = vmatprep.subr.bf16.mxu1 %v1733_v0 }
 0x489   :  { %1506 = vmatpush3.bf16.msra.mxu1 %v1633_v27 }
 0x48a   :  { %1507 = vmatprep.subr.bf16.mxu1 %v1733_v0 }
 0x48d   :  { %1508 = vmatpush3.bf16.msra.mxu1 %v1634_v28 }
 0x48e   :  { %1509 = vmatprep.subr.bf16.mxu1 %v1733_v0 }
 0x491   :  { %1510 = vmatpush3.bf16.msra.mxu1 %v1635_v29 }
 0x492   :  { %1511 = vmatprep.subr.bf16.mxu1 %v1733_v0 }
 0x495   :  { %1512 = vmatpush3.bf16.msra.mxu1 %v1636_v30 }
 0x496   :  { %1513 = vmatprep.subr.bf16.mxu1 %v1733_v0 }
 0x499   :  { %1514 = vmatpush3.bf16.msra.mxu1 %v1637_v31 }
 0x49a   :  { %1515 = vmatprep.subr.bf16.mxu1 %v1733_v0 }
 0x49d   :  { %1516 = vmatpush3.bf16.msra.mxu1 %v1638_v32 }
 0x49e   :  { %1517 = vmatprep.subr.bf16.mxu1 %v1733_v0 }
 0x4a1   :  { %1518 = vmatpush3.bf16.msra.mxu1 %v1639_v33 }
 0x4a2   :  { %1543 = vmatprep.subr.bf16.mxu1 %v1733_v0 }
 0x544   :  { %v653_v18 = vpop.f32.mrf.mxu1 }
 0x545   :  { %v654_v19 = vadd.f32 %v1219_v8, %v653_v18  ;;  %v1640_v8 = vld [vmem:[#allocation5 + $0x1b8] sm:$0xff]  }
 0x546   :  { %v1481_v20 = vpop.f32.mrf.mxu1 }
 0x547   :  { %v659_v21 = vadd.f32 %v654_v19, %v505_v63  ;;  %v794_v63 = vld [vmem:[#allocation7 + $0xa] sm:$0x1] }
 0x548   :  { %v656_v22 = vpop.f32.mrf.mxu1 }
 0x549   :  { %v660_v23 = vmax.f32 %v659_v21, 0.0  ;;  %v1646_v21 = vld [vmem:[#allocation5 + $0x188] sm:$0xff]   ;;  %v1647_v22 = vld [vmem:[#allocation5 + $0x180] sm:$0xff]  }
 0x54a   :  { %v1482_v24 = vpop.f32.mrf.mxu1 }
 0x54b   :  { %v661_v25 = vpack.c.bf16 %v660_v23, %v660_v23  ;;  %v1648_v23 = vld [vmem:[#allocation5 + $0x1f8] sm:$0xff]   ;;  %v1649_v24 = vld [vmem:[#allocation5 + $0x1f0] sm:$0xff]  }
 0x54d   :  { %1500 = vmatmul.mubr.bf16.vlgmr.msra.gmra.mxu0 %v661_v25  ;;  %v1650_v25 = vld [vmem:[#allocation5 + $0x1e8] sm:$0xff]  }
 0x54e   :  { %1539 = vmatprep.mubr.msk.bf16.mxu0 %vm1734_vm0, %v1733_v0  ;;  %1524 = vmatpush3.bf16.msra.mxu0 %v1632_v26  ;;  %v1651_v26 = vld [vmem:[#allocation5 + $0x1e0] sm:$0xff]  }
 0x54f   :  { %1525 = vmatprep.subr.bf16.mxu0 %v1733_v0 }
 0x552   :  { %1526 = vmatpush3.bf16.msra.mxu0 %v1633_v27  ;;  %v1652_v27 = vld [vmem:[#allocation5 + $0x1d8] sm:$0xff]  }
 0x553   :  { %1527 = vmatprep.subr.bf16.mxu0 %v1733_v0 }
 0x556   :  { %1528 = vmatpush3.bf16.msra.mxu0 %v1634_v28  ;;  %v1653_v28 = vld [vmem:[#allocation5 + $0x1d0] sm:$0xff]  }
 0x557   :  { %1529 = vmatprep.subr.bf16.mxu0 %v1733_v0 }
 0x55a   :  { %1530 = vmatpush3.bf16.msra.mxu0 %v1635_v29 }
 0x55b   :  { %1531 = vmatprep.subr.bf16.mxu0 %v1733_v0 }
 0x55e   :  { %1532 = vmatpush3.bf16.msra.mxu0 %v1636_v30 }
 0x55f   :  { %1533 = vmatprep.subr.bf16.mxu0 %v1733_v0 }
 0x562   :  { %1534 = vmatpush3.bf16.msra.mxu0 %v1637_v31 }
 0x563   :  { %1535 = vmatprep.subr.bf16.mxu0 %v1733_v0 }
 0x566   :  { %1536 = vmatpush3.bf16.msra.mxu0 %v1638_v32 }
 0x567   :  { %1537 = vmatprep.subr.bf16.mxu0 %v1733_v0 }
 0x56a   :  { %1538 = vmatpush3.bf16.msra.mxu0 %v1639_v33 }
 0x56b   :  { %1563 = vmatprep.subr.bf16.mxu0 %v1733_v0 }
 0x60d   :  { %v766_v35 = vpop.f32.mrf.mxu0 }
 0x60e   :  { %v767_v36 = vadd.f32 %v1228_v34, %v766_v35 }
 0x60f   :  { %v1501_v37 = vpop.f32.mrf.mxu0 }
 0x610   :  { %v772_v38 = vmax.f32 %v767_v36, 0.0  ;;  %v1654_v37 = vld [vmem:[#allocation5 + $0x1c8] sm:$0xff]  }
 0x611   :  { %v769_v39 = vpop.f32.mrf.mxu0 }
 0x612   :  { %v773_v40 = vrot.slane %v772_v38, 4  ;;  %v780_v41 = vmul.f32 %v772_v38, %v772_v38  ;;  %v1246_v39 = vld [vmem:[#allocation7 + $0xc] ss:$0 sm:$0xff] }
 0x613   :  { %v1502_v42 = vpop.f32.mrf.mxu0 }
 0x614   :  { %v774_v43 = vadd.f32 %v773_v40, %v772_v38  ;;  %v781_v44 = vrot.slane %v780_v41, 4 }
 0x616   :  { %v775_v45 = vrot.slane %v774_v43, 2  ;;  %v782_v46 = vadd.f32 %v781_v44, %v780_v41 }
 0x618   :  { %v776_v47 = vadd.f32 %v775_v45, %v774_v43  ;;  %v783_v49 = vrot.slane %v782_v46, 2 }
 0x61a   :  { %v777_v50 = vrot.slane %v776_v47, 1  ;;  %v784_v51 = vadd.f32 %v783_v49, %v782_v46 }
 0x61c   :  { %v778_v52 = vadd.f32 %v777_v50, %v776_v47  ;;  %v785_v53 = vrot.slane %v784_v51, 1  ;;  %v1255_v47 = vld [vmem:[#allocation7 + $0xd] ss:$0 sm:$0xff] }
 0x61e   :  { %v779_v54 = vmul.f32 0.125, %v778_v52  ;;  %v786_v55 = vadd.f32 %v785_v53, %v784_v51 }
 0x620   :  { %v787_v56 = vmul.f32 0.125, %v786_v55  ;;  %v788_v57 = vmul.f32 %v779_v54, %v779_v54 }
 0x622   :  { %v789_v58 = vsub.f32 %v787_v56, %v788_v57 }
 0x624   :  { %v791_v59 = vadd.f32 1e-05, %v789_v58 }
 0x626   :  { %1660 = vrsqrt.f32 %v791_v59 }
 0x633   :  { %v1661_v61 = vpop.eup %1660 }
 0x634   :  { %v793_v62 = vmul.f32 %v1661_v61, %v790_v60 }
 0x636   :  { %v795_v1 = vmul.f32 %v793_v62, %v779_v54  ;;  %v800_v2 = vrot.slane %v793_v62, %v1797_v48 }
 0x638   :  { %v796_v3 = vsub.f32 %v794_v63, %v795_v1  ;;  %v801_v4 = vmul.f32 %v800_v2, %v772_v38  ;;  %v1655_v38 = vld [vmem:[#allocation5 + $0x1c0] sm:$0xff]  }
 0x63a   :  { %v805_v5 = vrot.slane %v796_v3, %v1797_v48  ;;  %v1644_v48 = vld [vmem:[#allocation5 + $0x198] sm:$0xff]  }
 0x63c   :  { %v806_v6 = vadd.f32 %v805_v5, %v801_v4 }
 0x63e   :  { %v807_v7 = vpack.c.bf16 %v806_v6, %v806_v6 }
 0x640   :  { %1520 = vmatmul.mubr.bf16.vlgmr.msra.gmra.mxu1 %v807_v7 }
 0x641   :  { %1559 = vmatprep.mubr.msk.bf16.mxu1 %vm1734_vm0, %v1733_v0  ;;  %1544 = vmatpush3.bf16.msra.mxu1 %v1640_v8 }
 0x642   :  { %1545 = vmatprep.subr.bf16.mxu1 %v1733_v0 }
 0x645   :  { %1546 = vmatpush3.bf16.msra.mxu1 %v1641_v9 }
 0x646   :  { %1547 = vmatprep.subr.bf16.mxu1 %v1733_v0 }
 0x649   :  { %1548 = vmatpush3.bf16.msra.mxu1 %v1642_v10 }
 0x64a   :  { %1549 = vmatprep.subr.bf16.mxu1 %v1733_v0 }
 0x64d   :  { %1550 = vmatpush3.bf16.msra.mxu1 %v1643_v11 }
 0x64e   :  { %1551 = vmatprep.subr.bf16.mxu1 %v1733_v0 }
 0x651   :  { %1552 = vmatpush3.bf16.msra.mxu1 %v1644_v48 }
 0x652   :  { %1553 = vmatprep.subr.bf16.mxu1 %v1733_v0 }
 0x655   :  { %1554 = vmatpush3.bf16.msra.mxu1 %v1645_v12 }
 0x656   :  { %1555 = vmatprep.subr.bf16.mxu1 %v1733_v0 }
 0x659   :  { %1556 = vmatpush3.bf16.msra.mxu1 %v1646_v21 }
 0x65a   :  { %1557 = vmatprep.subr.bf16.mxu1 %v1733_v0 }
 0x65d   :  { %1558 = vmatpush3.bf16.msra.mxu1 %v1647_v22 }
 0x700   :  { %v912_v14 = vpop.f32.mrf.mxu1 }
 0x701   :  { %v913_v15 = vadd.f32 %v1237_v13, %v912_v14 }
 0x702   :  { %v1521_v16 = vpop.f32.mrf.mxu1 }
 0x703   :  { %v918_v17 = vmax.f32 %v913_v15, 0.0 }
 0x704   :  { %v915_v18 = vpop.f32.mrf.mxu1 }
 0x705   :  { %v919_v19 = vpack.c.bf16 %v918_v17, %v918_v17 }
 0x706   :  { %v1522_v20 = vpop.f32.mrf.mxu1 }
 0x707   :  { %1540 = vmatmul.mubr.bf16.vlgmr.msra.gmra.mxu0 %v919_v19 }
 0x708   :  { %1579 = vmatprep.mubr.msk.bf16.mxu0 %vm1734_vm0, %v1733_v0  ;;  %1564 = vmatpush3.bf16.msra.mxu0 %v1648_v23 }
 0x709   :  { %1565 = vmatprep.subr.bf16.mxu0 %v1733_v0 }
 0x70c   :  { %1566 = vmatpush3.bf16.msra.mxu0 %v1649_v24 }
 0x70d   :  { %1567 = vmatprep.subr.bf16.mxu0 %v1733_v0 }
 0x710   :  { %1568 = vmatpush3.bf16.msra.mxu0 %v1650_v25 }
 0x711   :  { %1569 = vmatprep.subr.bf16.mxu0 %v1733_v0 }
 0x714   :  { %1570 = vmatpush3.bf16.msra.mxu0 %v1651_v26 }
 0x715   :  { %1571 = vmatprep.subr.bf16.mxu0 %v1733_v0 }
 0x718   :  { %1572 = vmatpush3.bf16.msra.mxu0 %v1652_v27 }
 0x719   :  { %1573 = vmatprep.subr.bf16.mxu0 %v1733_v0 }
 0x71c   :  { %1574 = vmatpush3.bf16.msra.mxu0 %v1653_v28 }
 0x71d   :  { %1575 = vmatprep.subr.bf16.mxu0 %v1733_v0 }
 0x720   :  { %1576 = vmatpush3.bf16.msra.mxu0 %v1654_v37 }
 0x721   :  { %1577 = vmatprep.subr.bf16.mxu0 %v1733_v0 }
 0x724   :  { %1578 = vmatpush3.bf16.msra.mxu0 %v1655_v38 }
 0x7c7   :  { %v954_v29 = vpop.f32.mrf.mxu0 }
 0x7c8   :  { %v955_v30 = vadd.f32 %v1237_v13, %v954_v29 }
 0x7c9   :  { %v1541_v31 = vpop.f32.mrf.mxu0 }
 0x7ca   :  { %v960_v32 = vadd.f32 %v955_v30, %v806_v6 }
 0x7cb   :  { %v957_v33 = vpop.f32.mrf.mxu0 }
 0x7cc   :  { %v961_v34 = vmax.f32 %v960_v32, 0.0 }
 0x7cd   :  { %v1542_v35 = vpop.f32.mrf.mxu0 }
 0x7ce   :  { %v962_v36 = vpack.c.bf16 %v961_v34, %v961_v34 }
 0x7d0   :  { %1560 = vmatmul.mubr.bf16.vlgmr.msra.gmra.mxu1 %v962_v36 }
 0x890   :  { %v1067_v40 = vpop.f32.mrf.mxu1 }
 0x891   :  { %v1068_v41 = vadd.f32 %v1246_v39, %v1067_v40 }
 0x892   :  { %v1561_v42 = vpop.f32.mrf.mxu1 }
 0x893   :  { %v1073_v43 = vmax.f32 %v1068_v41, 0.0 }
 0x894   :  { %v1070_v44 = vpop.f32.mrf.mxu1 }
 0x895   :  { %v1074_v45 = vpack.c.bf16 %v1073_v43, %v1073_v43 }
 0x896   :  { %v1562_v46 = vpop.f32.mrf.mxu1 }
 0x897   :  { %1580 = vmatmul.mubr.bf16.vlgmr.msra.gmra.mxu0 %v1074_v45 }
 0x957   :  { %v1179_v49 = vpop.f32.mrf.mxu0 }
 0x958   :  { %v1180_v50 = vadd.f32 %v1255_v47, %v1179_v49 }
 0x959   :  { %v1581_v51 = vpop.f32.mrf.mxu0 }
 0x95a   :  { %1185 = vst [vmem:[%s1889_s3] sm:$0xff] %v1180_v50 }
 0x95b   :  { %v1182_v0 = vpop.f32.mrf.mxu0 }
 0x95d   :  { %v1582_v52 = vpop.f32.mrf.mxu0 }
 0x95e   :  { %1190 = vsyncpa [#allocation4], 1 }
 0x95f   :  { %1191 = vsyncpa [#allocation6], 1 }

</bundles_post_ra>
